<compile_context>
chip_gen: v5e
topology: v5e:2x2
jax: 0.10.0
libtpu: 0.0.40
codegen_flags: <defaults>
</compile_context>

<pallas_src>
import functools

import jax
import jax.numpy as jnp
from jax.experimental import pallas as pl
from jax.experimental.pallas import tpu as pltpu

_LANE = 128
_COMPUTE_DTYPE = jnp.bfloat16   # MXU operand dtype; accumulation stays f32


def _round_up(x: int, m: int) -> int:
    return (x + m - 1) // m * m


def _mlp_fused_kernel(x_ref, *refs, num_layers: int):
    """Fused MLP: x -> [Linear (+SiLU)] * (L-1) -> Linear.

    refs = (w1, b1, w2, b2, ..., wL, bL, o_ref).  Weights (bf16) and biases
    (f32) are full VMEM blocks; x_ref / o_ref are one batch tile.
    """
    o_ref = refs[-1]
    param_refs = refs[:-1]

    h = x_ref[...]
    for layer in range(num_layers):
        w = param_refs[2 * layer][...]        # (din_p, dout_p) bf16
        b = param_refs[2 * layer + 1][...]    # (1, dout_p)     f32
        # bf16 operands, f32 accumulate on the MXU; bias add + SiLU are free
        # epilogue work on the VPU/EUP in f32.
        h = jnp.dot(h.astype(w.dtype), w, preferred_element_type=jnp.float32) + b
        if layer != num_layers - 1:
            h = h * jax.nn.sigmoid(h)         # SiLU(x) = x * sigmoid(x)
    o_ref[...] = h.astype(o_ref.dtype)


def _pick_batch_tiling(batch: int) -> tuple[int, int]:
    """Return (padded_batch, tile_m)."""
    if batch <= _LANE:
        # Small batch: a single full-extent block (always a legal block shape).
        return batch, batch
    padded = _round_up(batch, _LANE)
    # Tile capped at 256: guarantees >= 2 grid steps so v7x's two TensorCores
    # can split the "parallel" batch axis, and keeps wide intermediates within
    # v5e's register/scratch budget (single vector-store slot).
    for tile in (256, 128):
        if padded % tile == 0 and padded // tile >= 2:
            return padded, tile
    return padded, _LANE


def _pad_params(params):
    """Zero-pad every layer's output feature dim up to a multiple of 128.

    Returns [(W_p bf16 (din_p, dout_p), b_p f32 (1, dout_p)), ...].  Padded
    columns have zero weight and zero bias -> exact no-ops; the wrapper slices
    the final output back to its true width.
    """
    padded = []
    din_p = params[0][0].shape[0]          # input K dim left unpadded
    for w, b in params:
        din, dout = w.shape
        dout_p = _round_up(dout, _LANE)
        w_p = jnp.zeros((din_p, dout_p), _COMPUTE_DTYPE)
        w_p = w_p.at[:din, :dout].set(w.astype(_COMPUTE_DTYPE))
        b_p = jnp.zeros((1, dout_p), jnp.float32).at[0, :dout].set(b)
        padded.append((w_p, b_p))
        din_p = dout_p
    return padded


def _const_spec(shape, single_buffer: bool) -> pl.BlockSpec:
    """Full-block spec pinned at (0, 0): DMA'd once, resident across the grid."""
    index_map = lambda i: (0, 0)
    if single_buffer:
        # Invariant block: double-buffering is pure VMEM waste (matters most on
        # v7x's 64 MiB VMEM once the MLP is scaled up).
        return pl.BlockSpec(shape, index_map, pipeline_mode=pl.Buffered(1))
    return pl.BlockSpec(shape, index_map)


def _mlp_pallas_call(x_p, padded_params, tile_m, single_buffer):
    b_pad, din = x_p.shape
    dout_p = padded_params[-1][0].shape[1]
    num_layers = len(padded_params)

    # Activation tile marches over the batch axis; weights/biases are pinned.
    in_specs = [pl.BlockSpec((tile_m, din), lambda i: (i, 0))]
    flat_args = [x_p]
    for w_p, b_p in padded_params:
        in_specs.append(_const_spec(w_p.shape, single_buffer))
        in_specs.append(_const_spec(b_p.shape, single_buffer))
        flat_args.extend((w_p, b_p))

    out_spec = pl.BlockSpec((tile_m, dout_p), lambda i: (i, 0))
    kernel = functools.partial(_mlp_fused_kernel, num_layers=num_layers)
    return pl.pallas_call(
        kernel,
        out_shape=jax.ShapeDtypeStruct((b_pad, dout_p), x_p.dtype),
        grid=(b_pad // tile_m,),
        in_specs=in_specs,
        out_specs=out_spec,
        compiler_params=pltpu.CompilerParams(
            dimension_semantics=("parallel",),
            # Explicit budget: >= every chip's scoped default, <= v7x's 64 MiB
            # physical; generous for these sizes, headroom for scaled-up dims.
            vmem_limit_bytes=32 * 1024 * 1024,
        ),
    )(*flat_args)


def mlp_forward(x, params):
    """Fused MLP forward as a single pallas_call.

    x: (B, dims[0]); params: list of (W, b) with W (dim_in, dim_out), b (dim_out,).
    """
    batch, din = x.shape
    assert len(params) >= 1 and params[0][0].shape[0] == din
    dout = params[-1][0].shape[1]

    b_pad, tile_m = _pick_batch_tiling(batch)
    padded_params = _pad_params(params)

    x_p = x
    if b_pad != batch:
        x_p = jnp.zeros((b_pad, din), x.dtype).at[:batch].set(x)

    single_buffer = hasattr(pl, "Buffered")
    try:
        out_p = _mlp_pallas_call(x_p, padded_params, tile_m, single_buffer)
    except Exception:
        if not single_buffer:
            raise
        # Fallback for jax versions that reject Buffered(1) on invariant inputs.
        out_p = _mlp_pallas_call(x_p, padded_params, tile_m, False)

    return out_p[:batch, :dout]


def init_mlp_params(key, dims):
    """Deterministic init matching nn.Linear: W (dim_in, dim_out), b (dim_out,),
    uniform(-1/sqrt(fan_in), 1/sqrt(fan_in))."""
    params = []
    for dim_in, dim_out in zip(dims[:-1], dims[1:]):
        key, kw, kb = jax.random.split(key, 3)
        bound = 1.0 / (dim_in ** 0.5)
        w = jax.random.uniform(kw, (dim_in, dim_out), jnp.float32,
                               minval=-bound, maxval=bound)
        b = jax.random.uniform(kb, (dim_out,), jnp.float32,
                               minval=-bound, maxval=bound)
        params.append((w, b))
    return params


def mlp_reference(x, params):
    n = len(params)
    for idx, (w, b) in enumerate(params, start=1):
        x = x @ w + b
        if idx != n:
            x = x * jax.nn.sigmoid(x)
    return x


if __name__ == "__main__":
    key = jax.random.PRNGKey(0)
    k_in, k_p = jax.random.split(key)

    # MLP(32, 64, 48, 16): 3 Linear layers, SiLU after the first two.
    dims = (32, 64, 48, 16)
    batch = 8

    x = jax.random.normal(k_in, (batch, dims[0]), jnp.float32)
    params = init_mlp_params(k_p, dims)

    out = jax.block_until_ready(mlp_forward(x, params))
    ref = mlp_reference(x, params)

    assert out.shape == (batch, dims[-1]), out.shape
    # bf16 MXU operands (f32 accumulate) vs. the all-f32 reference -> looser tol.
    assert jnp.allclose(out, ref, atol=5e-2, rtol=5e-2), \
        float(jnp.max(jnp.abs(out - ref)))

    print("KERNEL_OK")
</pallas_src>

<mosaic_0001>
module attributes {stable_mosaic.version = 11 : i64} {
  func.func @_mlp_fused_kernel(%arg0: i32, %arg1: memref<8x32xf32, #tpu.memory_space<vmem>>, %arg2: memref<32x128xbf16, #tpu.memory_space<vmem>>, %arg3: memref<1x128xf32, #tpu.memory_space<vmem>>, %arg4: memref<128x128xbf16, #tpu.memory_space<vmem>>, %arg5: memref<1x128xf32, #tpu.memory_space<vmem>>, %arg6: memref<128x128xbf16, #tpu.memory_space<vmem>>, %arg7: memref<1x128xf32, #tpu.memory_space<vmem>>, %arg8: memref<8x128xf32, #tpu.memory_space<vmem>>) attributes {dimension_semantics = [#tpu.dimension_semantics<parallel>], iteration_bounds = array<i64: 1>, scalar_prefetch = 0 : i64, scratch_operands = 0 : i64, tpu.core_type = #tpu.core_type<tc>, window_params = [{transform_indices = @transform_0, window_bounds = array<i64: 8, 32>}, {pipeline_mode = #tpu.pipeline_mode<synchronous>, transform_indices = @transform_1, window_bounds = array<i64: 32, 128>}, {pipeline_mode = #tpu.pipeline_mode<synchronous>, transform_indices = @transform_2, window_bounds = array<i64: 1, 128>}, {pipeline_mode = #tpu.pipeline_mode<synchronous>, transform_indices = @transform_3, window_bounds = array<i64: 128, 128>}, {pipeline_mode = #tpu.pipeline_mode<synchronous>, transform_indices = @transform_4, window_bounds = array<i64: 1, 128>}, {pipeline_mode = #tpu.pipeline_mode<synchronous>, transform_indices = @transform_5, window_bounds = array<i64: 128, 128>}, {pipeline_mode = #tpu.pipeline_mode<synchronous>, transform_indices = @transform_6, window_bounds = array<i64: 1, 128>}, {transform_indices = @transform_7, window_bounds = array<i64: 8, 128>}]} {
    %c0 = arith.constant 0 : index
    %c0_0 = arith.constant 0 : index
    %0 = vector.load %arg1[%c0, %c0_0] : memref<8x32xf32, #tpu.memory_space<vmem>>, vector<8x32xf32>
    %c0_1 = arith.constant 0 : index
    %c0_2 = arith.constant 0 : index
    %1 = vector.load %arg2[%c0_1, %c0_2] : memref<32x128xbf16, #tpu.memory_space<vmem>>, vector<32x128xbf16>
    %c0_3 = arith.constant 0 : index
    %c0_4 = arith.constant 0 : index
    %2 = vector.load %arg3[%c0_3, %c0_4] : memref<1x128xf32, #tpu.memory_space<vmem>>, vector<1x128xf32>
    %3 = arith.truncf %0 : vector<8x32xf32> to vector<8x32xbf16>
    %cst = arith.constant dense<0.000000e+00> : vector<8x128xf32>
    %4 = tpu.matmul %3, %1, %cst {dimension_numbers = #tpu.dot_dimension_numbers<[1], [0], [0], [1], [0, 0, 1, 1], [], []>} : vector<8x32xbf16>, vector<32x128xbf16>, vector<8x128xf32> -> vector<8x128xf32>
    %5 = vector.broadcast %2 : vector<1x128xf32> to vector<8x128xf32>
    %6 = arith.addf %4, %5 : vector<8x128xf32>
    %7 = arith.negf %6 : vector<8x128xf32>
    %8 = math.exp %7 : vector<8x128xf32>
    %cst_5 = arith.constant 1.000000e+00 : f32
    %9 = vector.broadcast %cst_5 : f32 to vector<8x128xf32>
    %10 = arith.addf %9, %8 : vector<8x128xf32>
    %11 = arith.divf %9, %10 : vector<8x128xf32>
    %12 = arith.mulf %6, %11 : vector<8x128xf32>
    %c0_6 = arith.constant 0 : index
    %c0_7 = arith.constant 0 : index
    %13 = vector.load %arg4[%c0_6, %c0_7] : memref<128x128xbf16, #tpu.memory_space<vmem>>, vector<128x128xbf16>
    %c0_8 = arith.constant 0 : index
    %c0_9 = arith.constant 0 : index
    %14 = vector.load %arg5[%c0_8, %c0_9] : memref<1x128xf32, #tpu.memory_space<vmem>>, vector<1x128xf32>
    %15 = arith.truncf %12 : vector<8x128xf32> to vector<8x128xbf16>
    %cst_10 = arith.constant dense<0.000000e+00> : vector<8x128xf32>
    %16 = tpu.matmul %15, %13, %cst_10 {dimension_numbers = #tpu.dot_dimension_numbers<[1], [0], [0], [1], [0, 0, 1, 1], [], []>} : vector<8x128xbf16>, vector<128x128xbf16>, vector<8x128xf32> -> vector<8x128xf32>
    %17 = vector.broadcast %14 : vector<1x128xf32> to vector<8x128xf32>
    %18 = arith.addf %16, %17 : vector<8x128xf32>
    %19 = arith.negf %18 : vector<8x128xf32>
    %20 = math.exp %19 : vector<8x128xf32>
    %cst_11 = arith.constant 1.000000e+00 : f32
    %21 = vector.broadcast %cst_11 : f32 to vector<8x128xf32>
    %22 = arith.addf %21, %20 : vector<8x128xf32>
    %23 = arith.divf %21, %22 : vector<8x128xf32>
    %24 = arith.mulf %18, %23 : vector<8x128xf32>
    %c0_12 = arith.constant 0 : index
    %c0_13 = arith.constant 0 : index
    %25 = vector.load %arg6[%c0_12, %c0_13] : memref<128x128xbf16, #tpu.memory_space<vmem>>, vector<128x128xbf16>
    %c0_14 = arith.constant 0 : index
    %c0_15 = arith.constant 0 : index
    %26 = vector.load %arg7[%c0_14, %c0_15] : memref<1x128xf32, #tpu.memory_space<vmem>>, vector<1x128xf32>
    %27 = arith.truncf %24 : vector<8x128xf32> to vector<8x128xbf16>
    %cst_16 = arith.constant dense<0.000000e+00> : vector<8x128xf32>
    %28 = tpu.matmul %27, %25, %cst_16 {dimension_numbers = #tpu.dot_dimension_numbers<[1], [0], [0], [1], [0, 0, 1, 1], [], []>} : vector<8x128xbf16>, vector<128x128xbf16>, vector<8x128xf32> -> vector<8x128xf32>
    %29 = vector.broadcast %26 : vector<1x128xf32> to vector<8x128xf32>
    %30 = arith.addf %28, %29 : vector<8x128xf32>
    %c0_17 = arith.constant 0 : index
    %c0_18 = arith.constant 0 : index
    %31 = vector.load %arg8[%c0_17, %c0_18] : memref<8x128xf32, #tpu.memory_space<vmem>>, vector<8x128xf32>
    tpu.vector_store %arg8[%c0_17, %c0_18], %30 {strides = array<i32>} : memref<8x128xf32, #tpu.memory_space<vmem>>, vector<8x128xf32>,
    return
  }
  func.func @transform_0(%arg0: i32) -> (i32, i32) {
    %c0_i32 = arith.constant 0 : i32
    %c0_i32_0 = arith.constant 0 : i32
    return %arg0, %c0_i32 : i32, i32
  }
  func.func @transform_1(%arg0: i32) -> (i32, i32) {
    %c0_i32 = arith.constant 0 : i32
    %c0_i32_0 = arith.constant 0 : i32
    %c0_i32_1 = arith.constant 0 : i32
    return %c0_i32, %c0_i32_0 : i32, i32
  }
  func.func @transform_2(%arg0: i32) -> (i32, i32) {
    %c0_i32 = arith.constant 0 : i32
    %c0_i32_0 = arith.constant 0 : i32
    %c0_i32_1 = arith.constant 0 : i32
    return %c0_i32, %c0_i32_0 : i32, i32
  }
  func.func @transform_3(%arg0: i32) -> (i32, i32) {
    %c0_i32 = arith.constant 0 : i32
    %c0_i32_0 = arith.constant 0 : i32
    %c0_i32_1 = arith.constant 0 : i32
    return %c0_i32, %c0_i32_0 : i32, i32
  }
  func.func @transform_4(%arg0: i32) -> (i32, i32) {
    %c0_i32 = arith.constant 0 : i32
    %c0_i32_0 = arith.constant 0 : i32
    %c0_i32_1 = arith.constant 0 : i32
    return %c0_i32, %c0_i32_0 : i32, i32
  }
  func.func @transform_5(%arg0: i32) -> (i32, i32) {
    %c0_i32 = arith.constant 0 : i32
    %c0_i32_0 = arith.constant 0 : i32
    %c0_i32_1 = arith.constant 0 : i32
    return %c0_i32, %c0_i32_0 : i32, i32
  }
  func.func @transform_6(%arg0: i32) -> (i32, i32) {
    %c0_i32 = arith.constant 0 : i32
    %c0_i32_0 = arith.constant 0 : i32
    %c0_i32_1 = arith.constant 0 : i32
    return %c0_i32, %c0_i32_0 : i32, i32
  }
  func.func @transform_7(%arg0: i32) -> (i32, i32) {
    %c0_i32 = arith.constant 0 : i32
    %c0_i32_0 = arith.constant 0 : i32
    return %arg0, %c0_i32 : i32, i32
  }
}

module attributes {stable_mosaic.version = 11 : i64} {
  func.func @_mlp_fused_kernel(%arg0: i32, %arg1: memref<8x32xf32, #tpu.memory_space<vmem>>, %arg2: memref<32x128xbf16, #tpu.memory_space<vmem>>, %arg3: memref<1x128xf32, #tpu.memory_space<vmem>>, %arg4: memref<128x128xbf16, #tpu.memory_space<vmem>>, %arg5: memref<1x128xf32, #tpu.memory_space<vmem>>, %arg6: memref<128x128xbf16, #tpu.memory_space<vmem>>, %arg7: memref<1x128xf32, #tpu.memory_space<vmem>>, %arg8: memref<8x128xf32, #tpu.memory_space<vmem>>) attributes {dimension_semantics = [#tpu.dimension_semantics<parallel>], iteration_bounds = array<i64: 1>, scalar_prefetch = 0 : i64, scratch_operands = 0 : i64, tpu.core_type = #tpu.core_type<tc>, window_params = [{transform_indices = @transform_0, window_bounds = array<i64: 8, 32>}, {pipeline_mode = #tpu.pipeline_mode<synchronous>, transform_indices = @transform_1, window_bounds = array<i64: 32, 128>}, {pipeline_mode = #tpu.pipeline_mode<synchronous>, transform_indices = @transform_2, window_bounds = array<i64: 1, 128>}, {pipeline_mode = #tpu.pipeline_mode<synchronous>, transform_indices = @transform_3, window_bounds = array<i64: 128, 128>}, {pipeline_mode = #tpu.pipeline_mode<synchronous>, transform_indices = @transform_4, window_bounds = array<i64: 1, 128>}, {pipeline_mode = #tpu.pipeline_mode<synchronous>, transform_indices = @transform_5, window_bounds = array<i64: 128, 128>}, {pipeline_mode = #tpu.pipeline_mode<synchronous>, transform_indices = @transform_6, window_bounds = array<i64: 1, 128>}, {transform_indices = @transform_7, window_bounds = array<i64: 8, 128>}]} {
    %c0 = arith.constant 0 : index
    %c0_0 = arith.constant 0 : index
    %0 = vector.load %arg1[%c0, %c0_0] : memref<8x32xf32, #tpu.memory_space<vmem>>, vector<8x32xf32>
    %c0_1 = arith.constant 0 : index
    %c0_2 = arith.constant 0 : index
    %1 = vector.load %arg2[%c0_1, %c0_2] : memref<32x128xbf16, #tpu.memory_space<vmem>>, vector<32x128xbf16>
    %c0_3 = arith.constant 0 : index
    %c0_4 = arith.constant 0 : index
    %2 = vector.load %arg3[%c0_3, %c0_4] : memref<1x128xf32, #tpu.memory_space<vmem>>, vector<1x128xf32>
    %3 = arith.truncf %0 : vector<8x32xf32> to vector<8x32xbf16>
    %cst = arith.constant dense<0.000000e+00> : vector<8x128xf32>
    %4 = tpu.matmul %3, %1, %cst {dimension_numbers = #tpu.dot_dimension_numbers<[1], [0], [0], [1], [0, 0, 1, 1], [], []>} : vector<8x32xbf16>, vector<32x128xbf16>, vector<8x128xf32> -> vector<8x128xf32>
    %5 = vector.broadcast %2 : vector<1x128xf32> to vector<8x128xf32>
    %6 = arith.addf %4, %5 : vector<8x128xf32>
    %7 = arith.negf %6 : vector<8x128xf32>
    %8 = math.exp %7 : vector<8x128xf32>
    %cst_5 = arith.constant 1.000000e+00 : f32
    %9 = vector.broadcast %cst_5 : f32 to vector<8x128xf32>
    %10 = arith.addf %9, %8 : vector<8x128xf32>
    %11 = arith.divf %9, %10 : vector<8x128xf32>
    %12 = arith.mulf %6, %11 : vector<8x128xf32>
    %c0_6 = arith.constant 0 : index
    %c0_7 = arith.constant 0 : index
    %13 = vector.load %arg4[%c0_6, %c0_7] : memref<128x128xbf16, #tpu.memory_space<vmem>>, vector<128x128xbf16>
    %c0_8 = arith.constant 0 : index
    %c0_9 = arith.constant 0 : index
    %14 = vector.load %arg5[%c0_8, %c0_9] : memref<1x128xf32, #tpu.memory_space<vmem>>, vector<1x128xf32>
    %15 = arith.truncf %12 : vector<8x128xf32> to vector<8x128xbf16>
    %cst_10 = arith.constant dense<0.000000e+00> : vector<8x128xf32>
    %16 = tpu.matmul %15, %13, %cst_10 {dimension_numbers = #tpu.dot_dimension_numbers<[1], [0], [0], [1], [0, 0, 1, 1], [], []>} : vector<8x128xbf16>, vector<128x128xbf16>, vector<8x128xf32> -> vector<8x128xf32>
    %17 = vector.broadcast %14 : vector<1x128xf32> to vector<8x128xf32>
    %18 = arith.addf %16, %17 : vector<8x128xf32>
    %19 = arith.negf %18 : vector<8x128xf32>
    %20 = math.exp %19 : vector<8x128xf32>
    %cst_11 = arith.constant 1.000000e+00 : f32
    %21 = vector.broadcast %cst_11 : f32 to vector<8x128xf32>
    %22 = arith.addf %21, %20 : vector<8x128xf32>
    %23 = arith.divf %21, %22 : vector<8x128xf32>
    %24 = arith.mulf %18, %23 : vector<8x128xf32>
    %c0_12 = arith.constant 0 : index
    %c0_13 = arith.constant 0 : index
    %25 = vector.load %arg6[%c0_12, %c0_13] : memref<128x128xbf16, #tpu.memory_space<vmem>>, vector<128x128xbf16>
    %c0_14 = arith.constant 0 : index
    %c0_15 = arith.constant 0 : index
    %26 = vector.load %arg7[%c0_14, %c0_15] : memref<1x128xf32, #tpu.memory_space<vmem>>, vector<1x128xf32>
    %27 = arith.truncf %24 : vector<8x128xf32> to vector<8x128xbf16>
    %cst_16 = arith.constant dense<0.000000e+00> : vector<8x128xf32>
    %28 = tpu.matmul %27, %25, %cst_16 {dimension_numbers = #tpu.dot_dimension_numbers<[1], [0], [0], [1], [0, 0, 1, 1], [], []>} : vector<8x128xbf16>, vector<128x128xbf16>, vector<8x128xf32> -> vector<8x128xf32>
    %29 = vector.broadcast %26 : vector<1x128xf32> to vector<8x128xf32>
    %30 = arith.addf %28, %29 : vector<8x128xf32>
    %c0_17 = arith.constant 0 : index
    %c0_18 = arith.constant 0 : index
    %31 = vector.load %arg8[%c0_17, %c0_18] : memref<8x128xf32, #tpu.memory_space<vmem>>, vector<8x128xf32>
    tpu.vector_store %arg8[%c0_17, %c0_18], %30 {strides = array<i32>} : memref<8x128xf32, #tpu.memory_space<vmem>>, vector<8x128xf32>,
    return
  }
  func.func @transform_0(%arg0: i32) -> (i32, i32) {
    %c0_i32 = arith.constant 0 : i32
    %c0_i32_0 = arith.constant 0 : i32
    return %arg0, %c0_i32 : i32, i32
  }
  func.func @transform_1(%arg0: i32) -> (i32, i32) {
    %c0_i32 = arith.constant 0 : i32
    %c0_i32_0 = arith.constant 0 : i32
    %c0_i32_1 = arith.constant 0 : i32
    return %c0_i32, %c0_i32_0 : i32, i32
  }
  func.func @transform_2(%arg0: i32) -> (i32, i32) {
    %c0_i32 = arith.constant 0 : i32
    %c0_i32_0 = arith.constant 0 : i32
    %c0_i32_1 = arith.constant 0 : i32
    return %c0_i32, %c0_i32_0 : i32, i32
  }
  func.func @transform_3(%arg0: i32) -> (i32, i32) {
    %c0_i32 = arith.constant 0 : i32
    %c0_i32_0 = arith.constant 0 : i32
    %c0_i32_1 = arith.constant 0 : i32
    return %c0_i32, %c0_i32_0 : i32, i32
  }
  func.func @transform_4(%arg0: i32) -> (i32, i32) {
    %c0_i32 = arith.constant 0 : i32
    %c0_i32_0 = arith.constant 0 : i32
    %c0_i32_1 = arith.constant 0 : i32
    return %c0_i32, %c0_i32_0 : i32, i32
  }
  func.func @transform_5(%arg0: i32) -> (i32, i32) {
    %c0_i32 = arith.constant 0 : i32
    %c0_i32_0 = arith.constant 0 : i32
    %c0_i32_1 = arith.constant 0 : i32
    return %c0_i32, %c0_i32_0 : i32, i32
  }
  func.func @transform_6(%arg0: i32) -> (i32, i32) {
    %c0_i32 = arith.constant 0 : i32
    %c0_i32_0 = arith.constant 0 : i32
    %c0_i32_1 = arith.constant 0 : i32
    return %c0_i32, %c0_i32_0 : i32, i32
  }
  func.func @transform_7(%arg0: i32) -> (i32, i32) {
    %c0_i32 = arith.constant 0 : i32
    %c0_i32_0 = arith.constant 0 : i32
    return %arg0, %c0_i32 : i32, i32
  }
}

</mosaic_0001>

<bundles_post_ra>
// kernel: tpu_custom_call.1
= control target key start
LH: loop header
LB: loop body
LE: loop exit
PB: predicated region body
PF: predicated region fallthrough
CT: control target
= control target key end

     0   :  { %12 = vsyncpa [#allocation3], 0  ;;  %s662_s0 = inlined_call_operand.hbm [shape: f32[8,32], index: 0, kind: input, shape index: {}]   ;;  %s663_s1 = inlined_call_operand.hbm [shape: bf16[32,128], index: 1, kind: input, shape index: {}]   ;;  %s664_s2 = inlined_call_operand.vmem [shape: f32[1,128], index: 2, kind: input, shape index: {}]   ;;  %s665_s3 = inlined_call_operand.hbm [shape: bf16[128,128], index: 3, kind: input, shape index: {}]   ;;  %s666_s4 = inlined_call_operand.vmem [shape: f32[1,128], index: 4, kind: input, shape index: {}]   ;;  %s667_s5 = inlined_call_operand.hbm [shape: bf16[128,128], index: 5, kind: input, shape index: {}]   ;;  %s668_s6 = inlined_call_operand.vmem [shape: f32[1,128], index: 6, kind: input, shape index: {}]   ;;  %s669_s7 = inlined_call_operand.hbm [shape: f32[8,128], index: 7, kind: output, shape index: {}]  }
   0x1   :  { %13 = vsyncpa [#allocation6], 0 }
   0x2   :  { %14 = vsyncpa [#allocation9], 0  ;;  %s31_s26 = sshll.u32 %s663_s1, 4  ;;  %s32_s26 = int_to_ptr.hbm [resolvable:$true] %s31_s26 }
   0x3   :  { %15 = vsyncpa [#allocation4], 0  ;;  %s591_s27 = smov [#allocation5]   ;;  %s21_s8 = sshll.u32 %s662_s0, 4  ;;  %s22_s8 = int_to_ptr.hbm [resolvable:$true] %s21_s8 }
   0x4   :  { %s33_s28 = sshll.u32 %s591_s27, 4  ;;  %s592_s9 = smov 64   ;;  %s34_s28 = int_to_ptr.vmem [resolvable:$true] %s33_s28 }
   0x5   :  { %s593_s10 = smov 4   ;;  %s594_s11 = smov [#allocation2]  }
   0x6   :  { %39 = dma.hbm_to_vmem [thread:$0]  %s32_s26, 256, %s34_s28, [#allocation6], %s592_s9, %s592_s9, %s593_s10  }
   0x7   :  { %s23_s12 = sshll.u32 %s594_s11, 4  ;;  %s46_s15 = sshll.u32 %s665_s3, 4  ;;  %s24_s12 = int_to_ptr.vmem [resolvable:$true] %s23_s12  ;;  %s47_s15 = int_to_ptr.hbm [resolvable:$true] %s46_s15 }
   0x8   :  { %26 = dma.hbm_to_vmem [thread:$0]  %s22_s8, 128, %s24_s12, [#allocation3]  }
   0x9   :  { %s61_s17 = sshll.u32 %s667_s5, 4  ;;  %s595_s18 = smov [#allocation7]   ;;  %s62_s17 = int_to_ptr.hbm [resolvable:$true] %s61_s17 }
   0xa   :  { %s48_s19 = sshll.u32 %s595_s18, 4  ;;  %s596_s0 = smov [#allocation8]   ;;  %s49_s19 = int_to_ptr.vmem [resolvable:$true] %s48_s19 }
   0xb   :  { %54 = dma.hbm_to_vmem [thread:$0]  %s47_s15, 1024, %s49_s19, [#allocation6], %s592_s9, %s592_s9, %s593_s10  }
   0xc   :  { %s63_s20 = sshll.u32 %s596_s0, 4  ;;  %s64_s20 = int_to_ptr.vmem [resolvable:$true] %s63_s20 }
   0xd   :  { %69 = dma.hbm_to_vmem [thread:$0]  %s62_s17, 1024, %s64_s20, [#allocation9], %s592_s9, %s592_s9, %s593_s10  }
   0xe   :  { %583 = dma.done.wait [#allocation3], 128  }
   0xf   :  { %584 = vsyncadd [#allocation3], 4294967168 }
  0x10   :  { %585 = dma.done.wait [#allocation6], 1280  }
  0x11   :  { %586 = vsyncadd [#allocation6], 4294966016 }
  0x12   :  { %587 = dma.done.wait [#allocation9], 1024  }
  0x13   :  { %588 = vsyncadd [#allocation9], 4294966272  ;;  %v428_v0 = vld [vmem:[#allocation5 + $0x8] sm:$0xff]  ;;  %v427_v1 = vld [vmem:[#allocation5] sm:$0xff]  ;;  %vm111_vm0 = vcmask 261120   ;;  %s597_s23 = smov [#allocation10]  }
  0x14   :  { %121 = vmatpush.bf16.msra.mxu0 %v428_v0  ;;  %v89_v2 = vld [vmem:[#allocation2] sm:$0xff]  ;;  %v436_v4 = vld [vmem:[#allocation7 + $0x38] sm:$0xff]  ;;  %v435_v5 = vld [vmem:[#allocation7 + $0x30] sm:$0xff]  ;;  %s338_s24 = sshll.u32 %s597_s23, 4  ;;  %s340_s27 = sshll.u32 %s669_s7, 4  ;;  %s339_s24 = int_to_ptr.vmem [resolvable:$true] %s338_s24  ;;  %s341_s27 = int_to_ptr.hbm [resolvable:$true] %s340_s27 }
  0x15   :  { %v95_v3 = vpack.c.bf16 %v89_v2, %v89_v2  ;;  %217 = vmatpush.bf16.msra.mxu1 %v436_v4  ;;  %v434_v6 = vld [vmem:[#allocation7 + $0x28] sm:$0xff]  ;;  %v433_v7 = vld [vmem:[#allocation7 + $0x20] sm:$0xff]  ;;  %v432_v8 = vld [vmem:[#allocation7 + $0x18] sm:$0xff] }
  0x16   :  { %v431_v9 = vld [vmem:[#allocation7 + $0x10] sm:$0xff]  ;;  %v430_v10 = vld [vmem:[#allocation7 + $0x8] sm:$0xff]  ;;  %v429_v11 = vld [vmem:[#allocation7] sm:$0xff] }
  0x17   :  { %v452_v12 = vld [vmem:[%s664_s2] ss:$0 sm:$0xff]  ;;  %v444_v31 = vld [vmem:[#allocation8 + $0x38] sm:$0xff]  ;;  %v443_v32 = vld [vmem:[#allocation8 + $0x30] sm:$0xff] }
  0x18   :  { %122 = vmatpush.bf16.msra.mxu0 %v427_v1  ;;  %319 = vmatpush.bf16.msra.mxu2 %v444_v31  ;;  %v442_v33 = vld [vmem:[#allocation8 + $0x28] sm:$0xff]  ;;  %v441_v34 = vld [vmem:[#allocation8 + $0x20] sm:$0xff]  ;;  %v440_v35 = vld [vmem:[#allocation8 + $0x18] sm:$0xff] }
  0x19   :  { %218 = vmatpush.bf16.msra.mxu1 %v435_v5  ;;  %v439_v36 = vld [vmem:[#allocation8 + $0x10] sm:$0xff]  ;;  %v438_v37 = vld [vmem:[#allocation8 + $0x8] sm:$0xff]  ;;  %v437_v38 = vld [vmem:[#allocation8] sm:$0xff] }
  0x1a   :  { %v453_v39 = vld [vmem:[%s666_s4] ss:$0 sm:$0xff] }
  0x1b   :  { %360 = vmatmul.msk.bf16.vlgmr.msra.gmra.mxu0 %vm111_vm0, %v95_v3  ;;  %v454_v58 = vld [vmem:[%s668_s6] ss:$0 sm:$0xff] }
  0x1c   :  { %320 = vmatpush.bf16.msra.mxu2 %v443_v32 }
  0x1d   :  { %219 = vmatpush.bf16.msra.mxu1 %v434_v6 }
  0x20   :  { %321 = vmatpush.bf16.msra.mxu2 %v442_v33 }
  0x21   :  { %220 = vmatpush.bf16.msra.mxu1 %v433_v7 }
  0x24   :  { %322 = vmatpush.bf16.msra.mxu2 %v441_v34 }
  0x25   :  { %221 = vmatpush.bf16.msra.mxu1 %v432_v8 }
  0x28   :  { %323 = vmatpush.bf16.msra.mxu2 %v440_v35 }
  0x29   :  { %222 = vmatpush.bf16.msra.mxu1 %v431_v9 }
  0x2c   :  { %324 = vmatpush.bf16.msra.mxu2 %v439_v36 }
  0x2d   :  { %223 = vmatpush.bf16.msra.mxu1 %v430_v10 }
  0x30   :  { %325 = vmatpush.bf16.msra.mxu2 %v438_v37 }
  0x31   :  { %224 = vmatpush.bf16.msra.mxu1 %v429_v11 }
  0x34   :  { %326 = vmatpush.bf16.msra.mxu2 %v437_v38 }
  0x98   :  { %v124_v13 = vpop.f32.mrf.mxu0 }
  0x99   :  { %v125_v14 = vadd.f32 %v452_v12, %v124_v13 }
  0x9b   :  { %v361_v15 = vmul.f32 -1.442695, %v125_v14 }
  0x9d   :  { %455 = vpow2.f32 %v361_v15 }
  0xa0   :  { %v126_v16 = vpop.f32.mrf.mxu0 }
  0xa3   :  { %v456_v17 = vpop.eup %455 }
  0xa4   :  { %v131_v18 = vadd.f32 1.0, %v456_v17 }
  0xa6   :  { %457 = vrcp.f32 %v131_v18  ;;  %v143_v22 = vand.u32 2147483648, %v131_v18  ;;  %v141_v24 = vand.u32 2147483647, %v131_v18  ;;  %vm137_vm2 = vweird.f32 %v131_v18 }
  0xa8   :  { %v144_v26 = vor.u32 1.1754944e-38, %v143_v22  ;;  %vm142_vm4 = vcmp.eq.f32.partialorder %v141_v24, 8.507059e+37 }
  0xac   :  { %v458_v19 = vpop.eup %457 }
  0xad   :  { %v133_v20 = vmul.f32 %v458_v19, %v131_v18  ;;  %vm138_vm1 = vweird.f32 %v458_v19 }
  0xae   :  { %vm139_vm3 = vmor %vm137_vm2, %vm138_vm1 }
  0xaf   :  { %v134_v21 = vsub.f32 1.0, %v133_v20 }
  0xb1   :  { %v135_v23 = vmul.f32 %v458_v19, %v134_v21 }
  0xb3   :  { %v136_v25 = vadd.f32 %v458_v19, %v135_v23 }
  0xb5   :  { %v140_v27 = vsel %vm139_vm3, %v458_v19, %v136_v25 }
  0xb6   :  { %v145_v28 = vsel %vm142_vm4, %v144_v26, %v140_v27 }
  0xb7   :  { %v147_v29 = vmul.f32 %v145_v28, %v125_v14 }
  0xb9   :  { %v165_v30 = vpack.c.bf16 %v147_v29, %v147_v29 }
  0xbb   :  { %225 = vmatmul.bf16.vlgmr.msra.gmra.mxu1 %v165_v30 }
 0x138   :  { %v226_v40 = vpop.f32.mrf.mxu1 }
 0x139   :  { %v227_v41 = vadd.f32 %v453_v39, %v226_v40 }
 0x13b   :  { %v394_v42 = vmul.f32 -1.442695, %v227_v41 }
 0x13d   :  { %459 = vpow2.f32 %v394_v42 }
 0x140   :  { %v228_v43 = vpop.f32.mrf.mxu1 }
 0x143   :  { %v460_v44 = vpop.eup %459 }
 0x144   :  { %v233_v45 = vadd.f32 1.0, %v460_v44 }
 0x146   :  { %461 = vrcp.f32 %v233_v45  ;;  %v245_v49 = vand.u32 2147483648, %v233_v45  ;;  %v243_v51 = vand.u32 2147483647, %v233_v45  ;;  %vm239_vm6 = vweird.f32 %v233_v45 }
 0x148   :  { %v246_v53 = vor.u32 1.1754944e-38, %v245_v49  ;;  %vm244_vm8 = vcmp.eq.f32.partialorder %v243_v51, 8.507059e+37 }
 0x14c   :  { %v462_v46 = vpop.eup %461 }
 0x14d   :  { %v235_v47 = vmul.f32 %v462_v46, %v233_v45  ;;  %vm240_vm5 = vweird.f32 %v462_v46 }
 0x14e   :  { %vm241_vm7 = vmor %vm239_vm6, %vm240_vm5 }
 0x14f   :  { %v236_v48 = vsub.f32 1.0, %v235_v47 }
 0x151   :  { %v237_v50 = vmul.f32 %v462_v46, %v236_v48 }
 0x153   :  { %v238_v52 = vadd.f32 %v462_v46, %v237_v50 }
 0x155   :  { %v242_v54 = vsel %vm241_vm7, %v462_v46, %v238_v52 }
 0x156   :  { %v247_v55 = vsel %vm244_vm8, %v246_v53, %v242_v54 }
 0x157   :  { %v249_v56 = vmul.f32 %v247_v55, %v227_v41 }
 0x159   :  { %v267_v57 = vpack.c.bf16 %v249_v56, %v249_v56 }
 0x15b   :  { %327 = vmatmul.bf16.vlgmr.msra.gmra.mxu2 %v267_v57 }
 0x1de   :  { %v328_v59 = vpop.f32.mrf.mxu2 }
 0x1df   :  { %v329_v60 = vadd.f32 %v454_v58, %v328_v59 }
 0x1e1   :  { %332 = vst [vmem:[#allocation10] sm:$0xff] %v329_v60 }
 0x1e2   :  { %343 = dma.vmem_to_hbm [thread:$0]  %s339_s24, 128, %s341_s27, [#allocation4]  }
 0x1e6   :  { %v330_v61 = vpop.f32.mrf.mxu2 }
 0x1e7   :  { %589 = dma.done.wait [#allocation4], 128  }
 0x1e8   :  { %590 = vsyncadd [#allocation4], 4294967168 }
 0x1e9   :  { %348 = vsyncpa [#allocation3], 1 }
 0x1ea   :  { %349 = vsyncpa [#allocation6], 1 }
 0x1eb   :  { %350 = vsyncpa [#allocation9], 1 }
 0x1ec   :  { %351 = vsyncpa [#allocation4], 1 }

// kernel: tpu_custom_call.1
= control target key start
LH: loop header
LB: loop body
LE: loop exit
PB: predicated region body
PF: predicated region fallthrough
CT: control target
= control target key end

     0   :  { %12 = vsyncpa [#allocation3], 0  ;;  %s662_s0 = inlined_call_operand.hbm [shape: f32[8,32], index: 0, kind: input, shape index: {}]   ;;  %s663_s1 = inlined_call_operand.hbm [shape: bf16[32,128], index: 1, kind: input, shape index: {}]   ;;  %s664_s2 = inlined_call_operand.vmem [shape: f32[1,128], index: 2, kind: input, shape index: {}]   ;;  %s665_s3 = inlined_call_operand.hbm [shape: bf16[128,128], index: 3, kind: input, shape index: {}]   ;;  %s666_s4 = inlined_call_operand.vmem [shape: f32[1,128], index: 4, kind: input, shape index: {}]   ;;  %s667_s5 = inlined_call_operand.hbm [shape: bf16[128,128], index: 5, kind: input, shape index: {}]   ;;  %s668_s6 = inlined_call_operand.vmem [shape: f32[1,128], index: 6, kind: input, shape index: {}]   ;;  %s669_s7 = inlined_call_operand.hbm [shape: f32[8,128], index: 7, kind: output, shape index: {}]  }
   0x1   :  { %13 = vsyncpa [#allocation6], 0 }
   0x2   :  { %14 = vsyncpa [#allocation9], 0  ;;  %s31_s26 = sshll.u32 %s663_s1, 4  ;;  %s32_s26 = int_to_ptr.hbm [resolvable:$true] %s31_s26 }
   0x3   :  { %15 = vsyncpa [#allocation4], 0  ;;  %s591_s27 = smov [#allocation5]   ;;  %s21_s8 = sshll.u32 %s662_s0, 4  ;;  %s22_s8 = int_to_ptr.hbm [resolvable:$true] %s21_s8 }
   0x4   :  { %s33_s28 = sshll.u32 %s591_s27, 4  ;;  %s592_s9 = smov 64   ;;  %s34_s28 = int_to_ptr.vmem [resolvable:$true] %s33_s28 }
   0x5   :  { %s593_s10 = smov 4   ;;  %s594_s11 = smov [#allocation2]  }
   0x6   :  { %39 = dma.hbm_to_vmem [thread:$0]  %s32_s26, 256, %s34_s28, [#allocation6], %s592_s9, %s592_s9, %s593_s10  }
   0x7   :  { %s23_s12 = sshll.u32 %s594_s11, 4  ;;  %s46_s15 = sshll.u32 %s665_s3, 4  ;;  %s24_s12 = int_to_ptr.vmem [resolvable:$true] %s23_s12  ;;  %s47_s15 = int_to_ptr.hbm [resolvable:$true] %s46_s15 }
   0x8   :  { %26 = dma.hbm_to_vmem [thread:$0]  %s22_s8, 128, %s24_s12, [#allocation3]  }
   0x9   :  { %s61_s17 = sshll.u32 %s667_s5, 4  ;;  %s595_s18 = smov [#allocation7]   ;;  %s62_s17 = int_to_ptr.hbm [resolvable:$true] %s61_s17 }
   0xa   :  { %s48_s19 = sshll.u32 %s595_s18, 4  ;;  %s596_s0 = smov [#allocation8]   ;;  %s49_s19 = int_to_ptr.vmem [resolvable:$true] %s48_s19 }
   0xb   :  { %54 = dma.hbm_to_vmem [thread:$0]  %s47_s15, 1024, %s49_s19, [#allocation6], %s592_s9, %s592_s9, %s593_s10  }
   0xc   :  { %s63_s20 = sshll.u32 %s596_s0, 4  ;;  %s64_s20 = int_to_ptr.vmem [resolvable:$true] %s63_s20 }
   0xd   :  { %69 = dma.hbm_to_vmem [thread:$0]  %s62_s17, 1024, %s64_s20, [#allocation9], %s592_s9, %s592_s9, %s593_s10  }
   0xe   :  { %583 = dma.done.wait [#allocation3], 128  }
   0xf   :  { %584 = vsyncadd [#allocation3], 4294967168 }
  0x10   :  { %585 = dma.done.wait [#allocation6], 1280  }
  0x11   :  { %586 = vsyncadd [#allocation6], 4294966016 }
  0x12   :  { %587 = dma.done.wait [#allocation9], 1024  }
  0x13   :  { %588 = vsyncadd [#allocation9], 4294966272  ;;  %v428_v0 = vld [vmem:[#allocation5 + $0x8] sm:$0xff]  ;;  %v427_v1 = vld [vmem:[#allocation5] sm:$0xff]  ;;  %vm111_vm0 = vcmask 261120   ;;  %s597_s23 = smov [#allocation10]  }
  0x14   :  { %121 = vmatpush.bf16.msra.mxu0 %v428_v0  ;;  %v89_v2 = vld [vmem:[#allocation2] sm:$0xff]  ;;  %v436_v4 = vld [vmem:[#allocation7 + $0x38] sm:$0xff]  ;;  %v435_v5 = vld [vmem:[#allocation7 + $0x30] sm:$0xff]  ;;  %s338_s24 = sshll.u32 %s597_s23, 4  ;;  %s340_s27 = sshll.u32 %s669_s7, 4  ;;  %s339_s24 = int_to_ptr.vmem [resolvable:$true] %s338_s24  ;;  %s341_s27 = int_to_ptr.hbm [resolvable:$true] %s340_s27 }
  0x15   :  { %v95_v3 = vpack.c.bf16 %v89_v2, %v89_v2  ;;  %217 = vmatpush.bf16.msra.mxu1 %v436_v4  ;;  %v434_v6 = vld [vmem:[#allocation7 + $0x28] sm:$0xff]  ;;  %v433_v7 = vld [vmem:[#allocation7 + $0x20] sm:$0xff]  ;;  %v432_v8 = vld [vmem:[#allocation7 + $0x18] sm:$0xff] }
  0x16   :  { %v431_v9 = vld [vmem:[#allocation7 + $0x10] sm:$0xff]  ;;  %v430_v10 = vld [vmem:[#allocation7 + $0x8] sm:$0xff]  ;;  %v429_v11 = vld [vmem:[#allocation7] sm:$0xff] }
  0x17   :  { %v452_v12 = vld [vmem:[%s664_s2] ss:$0 sm:$0xff]  ;;  %v444_v31 = vld [vmem:[#allocation8 + $0x38] sm:$0xff]  ;;  %v443_v32 = vld [vmem:[#allocation8 + $0x30] sm:$0xff] }
  0x18   :  { %122 = vmatpush.bf16.msra.mxu0 %v427_v1  ;;  %319 = vmatpush.bf16.msra.mxu2 %v444_v31  ;;  %v442_v33 = vld [vmem:[#allocation8 + $0x28] sm:$0xff]  ;;  %v441_v34 = vld [vmem:[#allocation8 + $0x20] sm:$0xff]  ;;  %v440_v35 = vld [vmem:[#allocation8 + $0x18] sm:$0xff] }
  0x19   :  { %218 = vmatpush.bf16.msra.mxu1 %v435_v5  ;;  %v439_v36 = vld [vmem:[#allocation8 + $0x10] sm:$0xff]  ;;  %v438_v37 = vld [vmem:[#allocation8 + $0x8] sm:$0xff]  ;;  %v437_v38 = vld [vmem:[#allocation8] sm:$0xff] }
  0x1a   :  { %v453_v39 = vld [vmem:[%s666_s4] ss:$0 sm:$0xff] }
  0x1b   :  { %360 = vmatmul.msk.bf16.vlgmr.msra.gmra.mxu0 %vm111_vm0, %v95_v3  ;;  %v454_v58 = vld [vmem:[%s668_s6] ss:$0 sm:$0xff] }
  0x1c   :  { %320 = vmatpush.bf16.msra.mxu2 %v443_v32 }
  0x1d   :  { %219 = vmatpush.bf16.msra.mxu1 %v434_v6 }
  0x20   :  { %321 = vmatpush.bf16.msra.mxu2 %v442_v33 }
  0x21   :  { %220 = vmatpush.bf16.msra.mxu1 %v433_v7 }
  0x24   :  { %322 = vmatpush.bf16.msra.mxu2 %v441_v34 }
  0x25   :  { %221 = vmatpush.bf16.msra.mxu1 %v432_v8 }
  0x28   :  { %323 = vmatpush.bf16.msra.mxu2 %v440_v35 }
  0x29   :  { %222 = vmatpush.bf16.msra.mxu1 %v431_v9 }
  0x2c   :  { %324 = vmatpush.bf16.msra.mxu2 %v439_v36 }
  0x2d   :  { %223 = vmatpush.bf16.msra.mxu1 %v430_v10 }
  0x30   :  { %325 = vmatpush.bf16.msra.mxu2 %v438_v37 }
  0x31   :  { %224 = vmatpush.bf16.msra.mxu1 %v429_v11 }
  0x34   :  { %326 = vmatpush.bf16.msra.mxu2 %v437_v38 }
  0x98   :  { %v124_v13 = vpop.f32.mrf.mxu0 }
  0x99   :  { %v125_v14 = vadd.f32 %v452_v12, %v124_v13 }
  0x9b   :  { %v361_v15 = vmul.f32 -1.442695, %v125_v14 }
  0x9d   :  { %455 = vpow2.f32 %v361_v15 }
  0xa0   :  { %v126_v16 = vpop.f32.mrf.mxu0 }
  0xa3   :  { %v456_v17 = vpop.eup %455 }
  0xa4   :  { %v131_v18 = vadd.f32 1.0, %v456_v17 }
  0xa6   :  { %457 = vrcp.f32 %v131_v18  ;;  %v143_v22 = vand.u32 2147483648, %v131_v18  ;;  %v141_v24 = vand.u32 2147483647, %v131_v18  ;;  %vm137_vm2 = vweird.f32 %v131_v18 }
  0xa8   :  { %v144_v26 = vor.u32 1.1754944e-38, %v143_v22  ;;  %vm142_vm4 = vcmp.eq.f32.partialorder %v141_v24, 8.507059e+37 }
  0xac   :  { %v458_v19 = vpop.eup %457 }
  0xad   :  { %v133_v20 = vmul.f32 %v458_v19, %v131_v18  ;;  %vm138_vm1 = vweird.f32 %v458_v19 }
  0xae   :  { %vm139_vm3 = vmor %vm137_vm2, %vm138_vm1 }
  0xaf   :  { %v134_v21 = vsub.f32 1.0, %v133_v20 }
  0xb1   :  { %v135_v23 = vmul.f32 %v458_v19, %v134_v21 }
  0xb3   :  { %v136_v25 = vadd.f32 %v458_v19, %v135_v23 }
  0xb5   :  { %v140_v27 = vsel %vm139_vm3, %v458_v19, %v136_v25 }
  0xb6   :  { %v145_v28 = vsel %vm142_vm4, %v144_v26, %v140_v27 }
  0xb7   :  { %v147_v29 = vmul.f32 %v145_v28, %v125_v14 }
  0xb9   :  { %v165_v30 = vpack.c.bf16 %v147_v29, %v147_v29 }
  0xbb   :  { %225 = vmatmul.bf16.vlgmr.msra.gmra.mxu1 %v165_v30 }
 0x138   :  { %v226_v40 = vpop.f32.mrf.mxu1 }
 0x139   :  { %v227_v41 = vadd.f32 %v453_v39, %v226_v40 }
 0x13b   :  { %v394_v42 = vmul.f32 -1.442695, %v227_v41 }
 0x13d   :  { %459 = vpow2.f32 %v394_v42 }
 0x140   :  { %v228_v43 = vpop.f32.mrf.mxu1 }
 0x143   :  { %v460_v44 = vpop.eup %459 }
 0x144   :  { %v233_v45 = vadd.f32 1.0, %v460_v44 }
 0x146   :  { %461 = vrcp.f32 %v233_v45  ;;  %v245_v49 = vand.u32 2147483648, %v233_v45  ;;  %v243_v51 = vand.u32 2147483647, %v233_v45  ;;  %vm239_vm6 = vweird.f32 %v233_v45 }
 0x148   :  { %v246_v53 = vor.u32 1.1754944e-38, %v245_v49  ;;  %vm244_vm8 = vcmp.eq.f32.partialorder %v243_v51, 8.507059e+37 }
 0x14c   :  { %v462_v46 = vpop.eup %461 }
 0x14d   :  { %v235_v47 = vmul.f32 %v462_v46, %v233_v45  ;;  %vm240_vm5 = vweird.f32 %v462_v46 }
 0x14e   :  { %vm241_vm7 = vmor %vm239_vm6, %vm240_vm5 }
 0x14f   :  { %v236_v48 = vsub.f32 1.0, %v235_v47 }
 0x151   :  { %v237_v50 = vmul.f32 %v462_v46, %v236_v48 }
 0x153   :  { %v238_v52 = vadd.f32 %v462_v46, %v237_v50 }
 0x155   :  { %v242_v54 = vsel %vm241_vm7, %v462_v46, %v238_v52 }
 0x156   :  { %v247_v55 = vsel %vm244_vm8, %v246_v53, %v242_v54 }
 0x157   :  { %v249_v56 = vmul.f32 %v247_v55, %v227_v41 }
 0x159   :  { %v267_v57 = vpack.c.bf16 %v249_v56, %v249_v56 }
 0x15b   :  { %327 = vmatmul.bf16.vlgmr.msra.gmra.mxu2 %v267_v57 }
 0x1de   :  { %v328_v59 = vpop.f32.mrf.mxu2 }
 0x1df   :  { %v329_v60 = vadd.f32 %v454_v58, %v328_v59 }
 0x1e1   :  { %332 = vst [vmem:[#allocation10] sm:$0xff] %v329_v60 }
 0x1e2   :  { %343 = dma.vmem_to_hbm [thread:$0]  %s339_s24, 128, %s341_s27, [#allocation4]  }
 0x1e6   :  { %v330_v61 = vpop.f32.mrf.mxu2 }
 0x1e7   :  { %589 = dma.done.wait [#allocation4], 128  }
 0x1e8   :  { %590 = vsyncadd [#allocation4], 4294967168 }
 0x1e9   :  { %348 = vsyncpa [#allocation3], 1 }
 0x1ea   :  { %349 = vsyncpa [#allocation6], 1 }
 0x1eb   :  { %350 = vsyncpa [#allocation9], 1 }
 0x1ec   :  { %351 = vsyncpa [#allocation4], 1 }

</bundles_post_ra>
